<compile_context>
chip_gen: v6e
topology: v6e:2x2x1
jax: 0.10.0
libtpu: 0.0.40
codegen_flags: <defaults>
</compile_context>

<pallas_src>
import jax
import jax.numpy as jnp
from jax.experimental import pallas as pl
from jax.experimental.pallas import tpu as pltpu


def _rup(x, m):
    return (x + m - 1) // m * m


def _fold_bn(w, b, gamma, beta, mean, var, eps=1e-5):
    """Fold eval-mode BatchNorm1d into a standard-layout conv weight (Cout, Cin, K)."""
    s = gamma / jnp.sqrt(var + eps)
    return w * s[:, None, None], s * (b - mean) + beta


@jax.jit
def up_forward(x1, x2, params):
    """x1: (B, in_ch, L1), x2: (B, in_ch - out_ch, L2). Returns (B, out_ch, L2 - 12)."""
    B, c_in, l1 = x1.shape
    _, c2, l2 = x2.shape
    k_up, stride, pad_t = 7, 2, 1
    k_c = 9

    # ---- fold BN (eval mode) into the three convs -------------------------------------
    w_t = params["up_w"]                                  # (in_ch, out_ch, 7) torch layout
    c_out = w_t.shape[1]
    w_up = jnp.flip(w_t, -1).transpose(1, 0, 2)           # equivalent standard conv (out,in,7)
    w_up, b_up = _fold_bn(w_up, params["up_b"], params["up_gamma"], params["up_beta"],
                          params["up_mean"], params["up_var"])
    w_c1, b_c1 = _fold_bn(params["c1_w"], params["c1_b"], params["c1_gamma"],
                          params["c1_beta"], params["c1_mean"], params["c1_var"])
    w_c2, b_c2 = _fold_bn(params["c2_w"], params["c2_b"], params["c2_gamma"],
                          params["c2_beta"], params["c2_mean"], params["c2_var"])
    assert w_c1.shape[1] == c2 + c_out, "cat([x2, x1]) channels must match double_conv in_ch"

    # ---- padded channel dims (sublane multiples for f32) ------------------------------
    c_in_p, c_out_p, c2_p = _rup(c_in, 8), _rup(c_out, 8), _rup(c2, 8)

    # ---- geometry ----------------------------------------------------------------------
    l_dil = (l1 - 1) * stride + 1
    pad_each = k_up - 1 - pad_t                           # 5
    l_z = l_dil + 2 * pad_each
    l_up = l_z - (k_up - 1)                               # ConvTranspose out length = 2*L1+3
    diff = l2 - l_up
    assert diff >= 0, "x2 must be at least as long as the upsampled x1"
    left = diff // 2
    l_mid = l2 + 2 - k_c + 1                              # L2 - 6
    l_out = l_mid + 2 - k_c + 1                           # L2 - 12
    assert l_out > 0

    LZ = _rup(l_z, 128)
    L2P = _rup(l2 + 2, 128)
    LOUT = _rup(l_out, 128)

    # ---- activations: zero-insert (stride-2), halo-pad, channel-pad, lane-pad to 128 ---
    x1c = jnp.pad(x1, ((0, 0), (0, c_in_p - c_in), (0, 0)))
    z = jnp.zeros((B, c_in_p, l_dil), x1.dtype).at[:, :, ::stride].set(x1c)
    z = jnp.pad(z, ((0, 0), (0, 0), (pad_each, pad_each + LZ - l_z)))
    x2c = jnp.pad(x2, ((0, 0), (0, c2_p - c2), (0, 0)))
    x2p = jnp.pad(x2c, ((0, 0), (0, 0), (1, 1 + L2P - (l2 + 2))))

    # ---- weights: tap-stacked (C_out_p, K*C_in_p) so each conv is ONE MXU contraction --
    def stack_taps(w, cin_p):                             # (co, ci, K) -> (c_out_p, K*cin_p)
        co, ci, kk = w.shape
        w = jnp.pad(w, ((0, c_out_p - co), (0, cin_p - ci), (0, 0)))
        return jnp.transpose(w, (0, 2, 1)).reshape(c_out_p, kk * cin_p)

    w_up_s = stack_taps(w_up, c_in_p)                                   # (cop, 7*cip)
    w_c1_s = jnp.concatenate([stack_taps(w_c1[:, :c2, :], c2_p),        # x2 half
                              stack_taps(w_c1[:, c2:, :], c_out_p)],    # x1 half
                             axis=1)                                    # (cop, 9*(c2p+cop))
    w_c2_s = stack_taps(w_c2, c_out_p)                                  # (cop, 9*cop)

    def col(b):
        return jnp.pad(b, (0, c_out_p - c_out)).reshape(c_out_p, 1).astype(jnp.float32)

    b_up_c, b_c1_c, b_c2_c = col(b_up), col(b_c1), col(b_c2)

    # ---- kernel -------------------------------------------------------------------------
    def kernel(z_ref, x2_ref, wup_ref, bup_ref, wc1_ref, bc1_ref, wc2_ref, bc2_ref,
               o_ref, x1_scr, h1_scr):
        # up path: ConvTranspose1d(k=7,s=2,p=1) + folded BN + ReLU, 7 taps in one dot.
        z_stack = jnp.concatenate(
            [z_ref[0, :, k:k + l_up] for k in range(k_up)], axis=0)      # (7*cip, l_up)
        x1u = jnp.maximum(
            jnp.dot(wup_ref[...], z_stack, preferred_element_type=jnp.float32)
            + bup_ref[...], 0.0)                                          # (cop, l_up)

        # F.pad(x1, (left, right)) + conv1's pad=1 halo: zero only the pad columns,
        # then write the interior (scratch fully re-written every grid step).
        x1_scr[:, :1 + left] = jnp.zeros((c_out_p, 1 + left), jnp.float32)
        x1_scr[:, 1 + left + l_up:] = jnp.zeros(
            (c_out_p, (l2 + 2) - (1 + left) - l_up), jnp.float32)
        x1_scr[:, 1 + left:1 + left + l_up] = x1u

        # double_conv layer 1 over cat([x2, x1]): both halves + all 9 taps in one dot.
        s1 = jnp.concatenate(
            [x2_ref[0, :, k:k + l_mid] for k in range(k_c)]
            + [x1_scr[:, k:k + l_mid] for k in range(k_c)], axis=0)       # (9*(c2p+cop), l_mid)
        h1 = jnp.maximum(
            jnp.dot(wc1_ref[...], s1, preferred_element_type=jnp.float32)
            + bc1_ref[...], 0.0)                                          # (cop, l_mid)

        h1_scr[:, :1] = jnp.zeros((c_out_p, 1), jnp.float32)
        h1_scr[:, 1 + l_mid:] = jnp.zeros(
            (c_out_p, LOUT + k_c - 1 - (1 + l_mid)), jnp.float32)
        h1_scr[:, 1:1 + l_mid] = h1

        # double_conv layer 2: computed over the full 128-padded width -> dense HBM store.
        s2 = jnp.concatenate([h1_scr[:, k:k + LOUT] for k in range(k_c)], axis=0)
        h2 = jnp.maximum(
            jnp.dot(wc2_ref[...], s2, preferred_element_type=jnp.float32)
            + bc2_ref[...], 0.0)                                          # (cop, LOUT)
        o_ref[0] = h2.astype(o_ref.dtype)

    flops = 2 * B * (c_out_p * (k_up * c_in_p) * l_up
                     + c_out_p * (k_c * (c2_p + c_out_p)) * l_mid
                     + c_out_p * (k_c * c_out_p) * LOUT)
    bytes_accessed = 4 * (z.size + x2p.size + w_up_s.size + w_c1_s.size + w_c2_s.size
                          + 3 * c_out_p + B * c_out_p * LOUT)

    out_p = pl.pallas_call(
        kernel,
        out_shape=jax.ShapeDtypeStruct((B, c_out_p, LOUT), x1.dtype),
        grid=(B,),
        in_specs=[
            pl.BlockSpec((1, c_in_p, LZ), lambda b: (b, 0, 0)),
            pl.BlockSpec((1, c2_p, L2P), lambda b: (b, 0, 0)),
            pl.BlockSpec(w_up_s.shape, lambda b: (0, 0)),
            pl.BlockSpec((c_out_p, 1), lambda b: (0, 0)),
            pl.BlockSpec(w_c1_s.shape, lambda b: (0, 0)),
            pl.BlockSpec((c_out_p, 1), lambda b: (0, 0)),
            pl.BlockSpec(w_c2_s.shape, lambda b: (0, 0)),
            pl.BlockSpec((c_out_p, 1), lambda b: (0, 0)),
        ],
        out_specs=pl.BlockSpec((1, c_out_p, LOUT), lambda b: (b, 0, 0)),
        scratch_shapes=[
            pltpu.VMEM((c_out_p, l2 + 2), jnp.float32),          # padded x1 (+ conv1 halo)
            pltpu.VMEM((c_out_p, LOUT + k_c - 1), jnp.float32),  # padded h1 (+ conv2 halo)
        ],
        compiler_params=pltpu.CompilerParams(
            dimension_semantics=("parallel",),
            vmem_limit_bytes=32 * 1024 * 1024),
        cost_estimate=pl.CostEstimate(
            flops=flops, transcendentals=0, bytes_accessed=bytes_accessed),
    )(z, x2p, w_up_s, b_up_c, w_c1_s, b_c1_c, w_c2_s, b_c2_c)

    return out_p[:, :c_out, :l_out]


def _reference(x1, x2, p, eps=1e-5):
    """Pure-JAX reference mirroring the PyTorch module (eval-mode BN)."""
    def bn(y, g, b, m, v):
        return (g[None, :, None] * (y - m[None, :, None])
                / jnp.sqrt(v[None, :, None] + eps) + b[None, :, None])

    w = jnp.flip(p["up_w"], -1).transpose(1, 0, 2)
    y = jax.lax.conv_general_dilated(
        x1, w, window_strides=(1,), padding=[(5, 5)], lhs_dilation=(2,),
        dimension_numbers=("NCH", "OIH", "NCH"))
    y = y + p["up_b"][None, :, None]
    y = jnp.maximum(bn(y, p["up_gamma"], p["up_beta"], p["up_mean"], p["up_var"]), 0.0)

    diff = x2.shape[2] - y.shape[2]
    y = jnp.pad(y, ((0, 0), (0, 0), (diff // 2, diff - diff // 2)))
    x = jnp.concatenate([x2, y], axis=1)

    def conv_bn_relu(x, w, b, g, bb, m, v):
        h = jax.lax.conv_general_dilated(
            x, w, window_strides=(1,), padding=[(1, 1)],
            dimension_numbers=("NCH", "OIH", "NCH"))
        h = h + b[None, :, None]
        return jnp.maximum(bn(h, g, bb, m, v), 0.0)

    h = conv_bn_relu(x, p["c1_w"], p["c1_b"], p["c1_gamma"], p["c1_beta"],
                     p["c1_mean"], p["c1_var"])
    h = conv_bn_relu(h, p["c2_w"], p["c2_b"], p["c2_gamma"], p["c2_beta"],
                     p["c2_mean"], p["c2_var"])
    return h


def _init_params(key, in_ch, out_ch):
    ks = jax.random.split(key, 18)
    p = {}
    p["up_w"] = 0.2 * jax.random.normal(ks[0], (in_ch, out_ch, 7), jnp.float32)
    p["up_b"] = 0.1 * jax.random.normal(ks[1], (out_ch,), jnp.float32)
    p["up_gamma"] = jax.random.uniform(ks[2], (out_ch,), jnp.float32, 0.5, 1.5)
    p["up_beta"] = 0.1 * jax.random.normal(ks[3], (out_ch,), jnp.float32)
    p["up_mean"] = 0.1 * jax.random.normal(ks[4], (out_ch,), jnp.float32)
    p["up_var"] = jax.random.uniform(ks[5], (out_ch,), jnp.float32, 0.5, 1.5)

    p["c1_w"] = 0.2 * jax.random.normal(ks[6], (out_ch, in_ch, 9), jnp.float32)
    p["c1_b"] = 0.1 * jax.random.normal(ks[7], (out_ch,), jnp.float32)
    p["c1_gamma"] = jax.random.uniform(ks[8], (out_ch,), jnp.float32, 0.5, 1.5)
    p["c1_beta"] = 0.1 * jax.random.normal(ks[9], (out_ch,), jnp.float32)
    p["c1_mean"] = 0.1 * jax.random.normal(ks[10], (out_ch,), jnp.float32)
    p["c1_var"] = jax.random.uniform(ks[11], (out_ch,), jnp.float32, 0.5, 1.5)

    p["c2_w"] = 0.2 * jax.random.normal(ks[12], (out_ch, out_ch, 9), jnp.float32)
    p["c2_b"] = 0.1 * jax.random.normal(ks[13], (out_ch,), jnp.float32)
    p["c2_gamma"] = jax.random.uniform(ks[14], (out_ch,), jnp.float32, 0.5, 1.5)
    p["c2_beta"] = 0.1 * jax.random.normal(ks[15], (out_ch,), jnp.float32)
    p["c2_mean"] = 0.1 * jax.random.normal(ks[16], (out_ch,), jnp.float32)
    p["c2_var"] = jax.random.uniform(ks[17], (out_ch,), jnp.float32, 0.5, 1.5)
    return p


if __name__ == "__main__":
    key = jax.random.PRNGKey(0)
    B, in_ch, out_ch = 2, 8, 4
    l1, l2 = 8, 24                      # up(x1) length = 2*8+3 = 19, padded to 24
    c2 = in_ch - out_ch                 # skip-connection channels

    k1, k2, kp = jax.random.split(key, 3)
    x1 = jax.random.normal(k1, (B, in_ch, l1), jnp.float32)
    x2 = jax.random.normal(k2, (B, c2, l2), jnp.float32)
    params = _init_params(kp, in_ch, out_ch)

    out = up_forward(x1, x2, params)
    out = jax.block_until_ready(out)

    ref = _reference(x1, x2, params)
    assert out.shape == (B, out_ch, l2 - 12), out.shape
    assert jnp.allclose(out, ref, atol=2e-4, rtol=2e-4), "mismatch vs reference"

    print("KERNEL_OK")
</pallas_src>

<mosaic_0001>
module attributes {stable_mosaic.version = 11 : i64} {
  func.func @kernel(%arg0: i32, %arg1: memref<1x8x128xf32, #tpu.memory_space<vmem>>, %arg2: memref<1x8x128xf32, #tpu.memory_space<vmem>>, %arg3: memref<8x56xf32, #tpu.memory_space<vmem>>, %arg4: memref<8x1xf32, #tpu.memory_space<vmem>>, %arg5: memref<8x144xf32, #tpu.memory_space<vmem>>, %arg6: memref<8x1xf32, #tpu.memory_space<vmem>>, %arg7: memref<8x72xf32, #tpu.memory_space<vmem>>, %arg8: memref<8x1xf32, #tpu.memory_space<vmem>>, %arg9: memref<1x8x128xf32, #tpu.memory_space<vmem>>, %arg10: memref<8x26xf32, #tpu.memory_space<vmem>>, %arg11: memref<8x136xf32, #tpu.memory_space<vmem>>) attributes {dimension_semantics = [#tpu.dimension_semantics<parallel>], iteration_bounds = array<i64: 2>, scalar_prefetch = 0 : i64, scratch_operands = 2 : i64, tpu.core_type = #tpu.core_type<tc>, window_params = [{transform_indices = @transform_0, window_bounds = array<i64: 1, 8, 128>}, {transform_indices = @transform_1, window_bounds = array<i64: 1, 8, 128>}, {pipeline_mode = #tpu.pipeline_mode<synchronous>, transform_indices = @transform_2, window_bounds = array<i64: 8, 56>}, {pipeline_mode = #tpu.pipeline_mode<synchronous>, transform_indices = @transform_3, window_bounds = array<i64: 8, 1>}, {pipeline_mode = #tpu.pipeline_mode<synchronous>, transform_indices = @transform_4, window_bounds = array<i64: 8, 144>}, {pipeline_mode = #tpu.pipeline_mode<synchronous>, transform_indices = @transform_5, window_bounds = array<i64: 8, 1>}, {pipeline_mode = #tpu.pipeline_mode<synchronous>, transform_indices = @transform_6, window_bounds = array<i64: 8, 72>}, {pipeline_mode = #tpu.pipeline_mode<synchronous>, transform_indices = @transform_7, window_bounds = array<i64: 8, 1>}, {transform_indices = @transform_8, window_bounds = array<i64: 1, 8, 128>}]} {
    %c0 = arith.constant 0 : index
    %c0_0 = arith.constant 0 : index
    %c0_1 = arith.constant 0 : index
    %0 = vector.load %arg1[%c0, %c0_0, %c0_1] : memref<1x8x128xf32, #tpu.memory_space<vmem>>, vector<1x8x19xf32>
    %1 = vector.shape_cast %0 : vector<1x8x19xf32> to vector<8x19xf32>
    %c0_2 = arith.constant 0 : index
    %c0_3 = arith.constant 0 : index
    %c1 = arith.constant 1 : index
    %2 = vector.load %arg1[%c0_2, %c0_3, %c1] : memref<1x8x128xf32, #tpu.memory_space<vmem>>, vector<1x8x19xf32>
    %3 = vector.shape_cast %2 : vector<1x8x19xf32> to vector<8x19xf32>
    %c0_4 = arith.constant 0 : index
    %c0_5 = arith.constant 0 : index
    %c2 = arith.constant 2 : index
    %4 = vector.load %arg1[%c0_4, %c0_5, %c2] : memref<1x8x128xf32, #tpu.memory_space<vmem>>, vector<1x8x19xf32>
    %5 = vector.shape_cast %4 : vector<1x8x19xf32> to vector<8x19xf32>
    %c0_6 = arith.constant 0 : index
    %c0_7 = arith.constant 0 : index
    %c3 = arith.constant 3 : index
    %6 = vector.load %arg1[%c0_6, %c0_7, %c3] : memref<1x8x128xf32, #tpu.memory_space<vmem>>, vector<1x8x19xf32>
    %7 = vector.shape_cast %6 : vector<1x8x19xf32> to vector<8x19xf32>
    %c0_8 = arith.constant 0 : index
    %c0_9 = arith.constant 0 : index
    %c4 = arith.constant 4 : index
    %8 = vector.load %arg1[%c0_8, %c0_9, %c4] : memref<1x8x128xf32, #tpu.memory_space<vmem>>, vector<1x8x19xf32>
    %9 = vector.shape_cast %8 : vector<1x8x19xf32> to vector<8x19xf32>
    %c0_10 = arith.constant 0 : index
    %c0_11 = arith.constant 0 : index
    %c5 = arith.constant 5 : index
    %10 = vector.load %arg1[%c0_10, %c0_11, %c5] : memref<1x8x128xf32, #tpu.memory_space<vmem>>, vector<1x8x19xf32>
    %11 = vector.shape_cast %10 : vector<1x8x19xf32> to vector<8x19xf32>
    %c0_12 = arith.constant 0 : index
    %c0_13 = arith.constant 0 : index
    %c6 = arith.constant 6 : index
    %12 = vector.load %arg1[%c0_12, %c0_13, %c6] : memref<1x8x128xf32, #tpu.memory_space<vmem>>, vector<1x8x19xf32>
    %13 = vector.shape_cast %12 : vector<1x8x19xf32> to vector<8x19xf32>
    %14 = tpu.concatenate %1, %3, %5, %7, %9, %11, %13 in 0 : vector<8x19xf32>, vector<8x19xf32>, vector<8x19xf32>, vector<8x19xf32>, vector<8x19xf32>, vector<8x19xf32>, vector<8x19xf32> -> vector<56x19xf32>
    %c0_14 = arith.constant 0 : index
    %c0_15 = arith.constant 0 : index
    %15 = vector.load %arg3[%c0_14, %c0_15] : memref<8x56xf32, #tpu.memory_space<vmem>>, vector<8x56xf32>
    %cst = arith.constant dense<0.000000e+00> : vector<8x19xf32>
    %16 = tpu.matmul %15, %14, %cst {dimension_numbers = #tpu.dot_dimension_numbers<[1], [0], [0], [1], [0, 0, 1, 1], [], []>} : vector<8x56xf32>, vector<56x19xf32>, vector<8x19xf32> -> vector<8x19xf32>
    %c0_16 = arith.constant 0 : index
    %c0_17 = arith.constant 0 : index
    %17 = vector.load %arg4[%c0_16, %c0_17] : memref<8x1xf32, #tpu.memory_space<vmem>>, vector<8x1xf32>
    %18 = vector.broadcast %17 : vector<8x1xf32> to vector<8x19xf32>
    %19 = arith.addf %16, %18 : vector<8x19xf32>
    %cst_18 = arith.constant 0.000000e+00 : f32
    %20 = vector.broadcast %cst_18 : f32 to vector<8x19xf32>
    %21 = arith.maximumf %19, %20 : vector<8x19xf32>
    %cst_19 = arith.constant 0.000000e+00 : f32
    %22 = vector.broadcast %cst_19 : f32 to vector<8x3xf32>
    %c0_20 = arith.constant 0 : index
    %c0_21 = arith.constant 0 : index
    %23 = vector.load %arg10[%c0_20, %c0_21] : memref<8x26xf32, #tpu.memory_space<vmem>>, vector<8x3xf32>
    tpu.vector_store %arg10[%c0_20, %c0_21], %22 {strides = array<i32>} : memref<8x26xf32, #tpu.memory_space<vmem>>, vector<8x3xf32>,
    %cst_22 = arith.constant 0.000000e+00 : f32
    %24 = vector.broadcast %cst_22 : f32 to vector<8x4xf32>
    %c0_23 = arith.constant 0 : index
    %c22 = arith.constant 22 : index
    %25 = vector.load %arg10[%c0_23, %c22] : memref<8x26xf32, #tpu.memory_space<vmem>>, vector<8x4xf32>
    tpu.vector_store %arg10[%c0_23, %c22], %24 {strides = array<i32>} : memref<8x26xf32, #tpu.memory_space<vmem>>, vector<8x4xf32>,
    %c0_24 = arith.constant 0 : index
    %c3_25 = arith.constant 3 : index
    %26 = vector.load %arg10[%c0_24, %c3_25] : memref<8x26xf32, #tpu.memory_space<vmem>>, vector<8x19xf32>
    tpu.vector_store %arg10[%c0_24, %c3_25], %21 {strides = array<i32>} : memref<8x26xf32, #tpu.memory_space<vmem>>, vector<8x19xf32>,
    %c0_26 = arith.constant 0 : index
    %c0_27 = arith.constant 0 : index
    %c0_28 = arith.constant 0 : index
    %27 = vector.load %arg2[%c0_26, %c0_27, %c0_28] : memref<1x8x128xf32, #tpu.memory_space<vmem>>, vector<1x8x18xf32>
    %28 = vector.shape_cast %27 : vector<1x8x18xf32> to vector<8x18xf32>
    %c0_29 = arith.constant 0 : index
    %c0_30 = arith.constant 0 : index
    %c1_31 = arith.constant 1 : index
    %29 = vector.load %arg2[%c0_29, %c0_30, %c1_31] : memref<1x8x128xf32, #tpu.memory_space<vmem>>, vector<1x8x18xf32>
    %30 = vector.shape_cast %29 : vector<1x8x18xf32> to vector<8x18xf32>
    %c0_32 = arith.constant 0 : index
    %c0_33 = arith.constant 0 : index
    %c2_34 = arith.constant 2 : index
    %31 = vector.load %arg2[%c0_32, %c0_33, %c2_34] : memref<1x8x128xf32, #tpu.memory_space<vmem>>, vector<1x8x18xf32>
    %32 = vector.shape_cast %31 : vector<1x8x18xf32> to vector<8x18xf32>
    %c0_35 = arith.constant 0 : index
    %c0_36 = arith.constant 0 : index
    %c3_37 = arith.constant 3 : index
    %33 = vector.load %arg2[%c0_35, %c0_36, %c3_37] : memref<1x8x128xf32, #tpu.memory_space<vmem>>, vector<1x8x18xf32>
    %34 = vector.shape_cast %33 : vector<1x8x18xf32> to vector<8x18xf32>
    %c0_38 = arith.constant 0 : index
    %c0_39 = arith.constant 0 : index
    %c4_40 = arith.constant 4 : index
    %35 = vector.load %arg2[%c0_38, %c0_39, %c4_40] : memref<1x8x128xf32, #tpu.memory_space<vmem>>, vector<1x8x18xf32>
    %36 = vector.shape_cast %35 : vector<1x8x18xf32> to vector<8x18xf32>
    %c0_41 = arith.constant 0 : index
    %c0_42 = arith.constant 0 : index
    %c5_43 = arith.constant 5 : index
    %37 = vector.load %arg2[%c0_41, %c0_42, %c5_43] : memref<1x8x128xf32, #tpu.memory_space<vmem>>, vector<1x8x18xf32>
    %38 = vector.shape_cast %37 : vector<1x8x18xf32> to vector<8x18xf32>
    %c0_44 = arith.constant 0 : index
    %c0_45 = arith.constant 0 : index
    %c6_46 = arith.constant 6 : index
    %39 = vector.load %arg2[%c0_44, %c0_45, %c6_46] : memref<1x8x128xf32, #tpu.memory_space<vmem>>, vector<1x8x18xf32>
    %40 = vector.shape_cast %39 : vector<1x8x18xf32> to vector<8x18xf32>
    %c0_47 = arith.constant 0 : index
    %c0_48 = arith.constant 0 : index
    %c7 = arith.constant 7 : index
    %41 = vector.load %arg2[%c0_47, %c0_48, %c7] : memref<1x8x128xf32, #tpu.memory_space<vmem>>, vector<1x8x18xf32>
    %42 = vector.shape_cast %41 : vector<1x8x18xf32> to vector<8x18xf32>
    %c0_49 = arith.constant 0 : index
    %c0_50 = arith.constant 0 : index
    %c8 = arith.constant 8 : index
    %43 = vector.load %arg2[%c0_49, %c0_50, %c8] : memref<1x8x128xf32, #tpu.memory_space<vmem>>, vector<1x8x18xf32>
    %44 = vector.shape_cast %43 : vector<1x8x18xf32> to vector<8x18xf32>
    %c0_51 = arith.constant 0 : index
    %c0_52 = arith.constant 0 : index
    %45 = vector.load %arg10[%c0_51, %c0_52] : memref<8x26xf32, #tpu.memory_space<vmem>>, vector<8x18xf32>
    %c0_53 = arith.constant 0 : index
    %c1_54 = arith.constant 1 : index
    %46 = vector.load %arg10[%c0_53, %c1_54] : memref<8x26xf32, #tpu.memory_space<vmem>>, vector<8x18xf32>
    %c0_55 = arith.constant 0 : index
    %c2_56 = arith.constant 2 : index
    %47 = vector.load %arg10[%c0_55, %c2_56] : memref<8x26xf32, #tpu.memory_space<vmem>>, vector<8x18xf32>
    %c0_57 = arith.constant 0 : index
    %c3_58 = arith.constant 3 : index
    %48 = vector.load %arg10[%c0_57, %c3_58] : memref<8x26xf32, #tpu.memory_space<vmem>>, vector<8x18xf32>
    %c0_59 = arith.constant 0 : index
    %c4_60 = arith.constant 4 : index
    %49 = vector.load %arg10[%c0_59, %c4_60] : memref<8x26xf32, #tpu.memory_space<vmem>>, vector<8x18xf32>
    %c0_61 = arith.constant 0 : index
    %c5_62 = arith.constant 5 : index
    %50 = vector.load %arg10[%c0_61, %c5_62] : memref<8x26xf32, #tpu.memory_space<vmem>>, vector<8x18xf32>
    %c0_63 = arith.constant 0 : index
    %c6_64 = arith.constant 6 : index
    %51 = vector.load %arg10[%c0_63, %c6_64] : memref<8x26xf32, #tpu.memory_space<vmem>>, vector<8x18xf32>
    %c0_65 = arith.constant 0 : index
    %c7_66 = arith.constant 7 : index
    %52 = vector.load %arg10[%c0_65, %c7_66] : memref<8x26xf32, #tpu.memory_space<vmem>>, vector<8x18xf32>
    %c0_67 = arith.constant 0 : index
    %c8_68 = arith.constant 8 : index
    %53 = vector.load %arg10[%c0_67, %c8_68] : memref<8x26xf32, #tpu.memory_space<vmem>>, vector<8x18xf32>
    %54 = tpu.concatenate %28, %30, %32, %34, %36, %38, %40, %42, %44, %45, %46, %47, %48, %49, %50, %51 in 0 : vector<8x18xf32>, vector<8x18xf32>, vector<8x18xf32>, vector<8x18xf32>, vector<8x18xf32>, vector<8x18xf32>, vector<8x18xf32>, vector<8x18xf32>, vector<8x18xf32>, vector<8x18xf32>, vector<8x18xf32>, vector<8x18xf32>, vector<8x18xf32>, vector<8x18xf32>, vector<8x18xf32>, vector<8x18xf32> -> vector<128x18xf32>
    %55 = tpu.concatenate %52, %53 in 0 : vector<8x18xf32>, vector<8x18xf32> -> vector<16x18xf32>
    %56 = tpu.concatenate %54, %55 in 0 : vector<128x18xf32>, vector<16x18xf32> -> vector<144x18xf32>
    %c0_69 = arith.constant 0 : index
    %c0_70 = arith.constant 0 : index
    %57 = vector.load %arg5[%c0_69, %c0_70] : memref<8x144xf32, #tpu.memory_space<vmem>>, vector<8x144xf32>
    %cst_71 = arith.constant dense<0.000000e+00> : vector<8x18xf32>
    %58 = tpu.matmul %57, %56, %cst_71 {dimension_numbers = #tpu.dot_dimension_numbers<[1], [0], [0], [1], [0, 0, 1, 1], [], []>} : vector<8x144xf32>, vector<144x18xf32>, vector<8x18xf32> -> vector<8x18xf32>
    %c0_72 = arith.constant 0 : index
    %c0_73 = arith.constant 0 : index
    %59 = vector.load %arg6[%c0_72, %c0_73] : memref<8x1xf32, #tpu.memory_space<vmem>>, vector<8x1xf32>
    %60 = vector.broadcast %59 : vector<8x1xf32> to vector<8x18xf32>
    %61 = arith.addf %58, %60 : vector<8x18xf32>
    %cst_74 = arith.constant 0.000000e+00 : f32
    %62 = vector.broadcast %cst_74 : f32 to vector<8x18xf32>
    %63 = arith.maximumf %61, %62 : vector<8x18xf32>
    %cst_75 = arith.constant 0.000000e+00 : f32
    %64 = vector.broadcast %cst_75 : f32 to vector<8x1xf32>
    %c0_76 = arith.constant 0 : index
    %c0_77 = arith.constant 0 : index
    %65 = vector.load %arg11[%c0_76, %c0_77] : memref<8x136xf32, #tpu.memory_space<vmem>>, vector<8x1xf32>
    tpu.vector_store %arg11[%c0_76, %c0_77], %64 {strides = array<i32>} : memref<8x136xf32, #tpu.memory_space<vmem>>, vector<8x1xf32>,
    %cst_78 = arith.constant 0.000000e+00 : f32
    %66 = vector.broadcast %cst_78 : f32 to vector<8x117xf32>
    %c0_79 = arith.constant 0 : index
    %c19 = arith.constant 19 : index
    %67 = vector.load %arg11[%c0_79, %c19] : memref<8x136xf32, #tpu.memory_space<vmem>>, vector<8x117xf32>
    tpu.vector_store %arg11[%c0_79, %c19], %66 {strides = array<i32>} : memref<8x136xf32, #tpu.memory_space<vmem>>, vector<8x117xf32>,
    %c0_80 = arith.constant 0 : index
    %c1_81 = arith.constant 1 : index
    %68 = vector.load %arg11[%c0_80, %c1_81] : memref<8x136xf32, #tpu.memory_space<vmem>>, vector<8x18xf32>
    tpu.vector_store %arg11[%c0_80, %c1_81], %63 {strides = array<i32>} : memref<8x136xf32, #tpu.memory_space<vmem>>, vector<8x18xf32>,
    %c0_82 = arith.constant 0 : index
    %c0_83 = arith.constant 0 : index
    %69 = vector.load %arg11[%c0_82, %c0_83] : memref<8x136xf32, #tpu.memory_space<vmem>>, vector<8x128xf32>
    %c0_84 = arith.constant 0 : index
    %c1_85 = arith.constant 1 : index
    %70 = vector.load %arg11[%c0_84, %c1_85] : memref<8x136xf32, #tpu.memory_space<vmem>>, vector<8x128xf32>
    %c0_86 = arith.constant 0 : index
    %c2_87 = arith.constant 2 : index
    %71 = vector.load %arg11[%c0_86, %c2_87] : memref<8x136xf32, #tpu.memory_space<vmem>>, vector<8x128xf32>
    %c0_88 = arith.constant 0 : index
    %c3_89 = arith.constant 3 : index
    %72 = vector.load %arg11[%c0_88, %c3_89] : memref<8x136xf32, #tpu.memory_space<vmem>>, vector<8x128xf32>
    %c0_90 = arith.constant 0 : index
    %c4_91 = arith.constant 4 : index
    %73 = vector.load %arg11[%c0_90, %c4_91] : memref<8x136xf32, #tpu.memory_space<vmem>>, vector<8x128xf32>
    %c0_92 = arith.constant 0 : index
    %c5_93 = arith.constant 5 : index
    %74 = vector.load %arg11[%c0_92, %c5_93] : memref<8x136xf32, #tpu.memory_space<vmem>>, vector<8x128xf32>
    %c0_94 = arith.constant 0 : index
    %c6_95 = arith.constant 6 : index
    %75 = vector.load %arg11[%c0_94, %c6_95] : memref<8x136xf32, #tpu.memory_space<vmem>>, vector<8x128xf32>
    %c0_96 = arith.constant 0 : index
    %c7_97 = arith.constant 7 : index
    %76 = vector.load %arg11[%c0_96, %c7_97] : memref<8x136xf32, #tpu.memory_space<vmem>>, vector<8x128xf32>
    %c0_98 = arith.constant 0 : index
    %c8_99 = arith.constant 8 : index
    %77 = vector.load %arg11[%c0_98, %c8_99] : memref<8x136xf32, #tpu.memory_space<vmem>>, vector<8x128xf32>
    %78 = tpu.concatenate %69, %70, %71, %72, %73, %74, %75, %76, %77 in 0 : vector<8x128xf32>, vector<8x128xf32>, vector<8x128xf32>, vector<8x128xf32>, vector<8x128xf32>, vector<8x128xf32>, vector<8x128xf32>, vector<8x128xf32>, vector<8x128xf32> -> vector<72x128xf32>
    %c0_100 = arith.constant 0 : index
    %c0_101 = arith.constant 0 : index
    %79 = vector.load %arg7[%c0_100, %c0_101] : memref<8x72xf32, #tpu.memory_space<vmem>>, vector<8x72xf32>
    %cst_102 = arith.constant dense<0.000000e+00> : vector<8x128xf32>
    %80 = tpu.matmul %79, %78, %cst_102 {dimension_numbers = #tpu.dot_dimension_numbers<[1], [0], [0], [1], [0, 0, 1, 1], [], []>} : vector<8x72xf32>, vector<72x128xf32>, vector<8x128xf32> -> vector<8x128xf32>
    %c0_103 = arith.constant 0 : index
    %c0_104 = arith.constant 0 : index
    %81 = vector.load %arg8[%c0_103, %c0_104] : memref<8x1xf32, #tpu.memory_space<vmem>>, vector<8x1xf32>
    %82 = vector.broadcast %81 : vector<8x1xf32> to vector<8x128xf32>
    %83 = arith.addf %80, %82 : vector<8x128xf32>
    %cst_105 = arith.constant 0.000000e+00 : f32
    %84 = vector.broadcast %cst_105 : f32 to vector<8x128xf32>
    %85 = arith.maximumf %83, %84 : vector<8x128xf32>
    %c0_106 = arith.constant 0 : index
    %c0_107 = arith.constant 0 : index
    %c0_108 = arith.constant 0 : index
    %86 = vector.load %arg9[%c0_106, %c0_107, %c0_108] : memref<1x8x128xf32, #tpu.memory_space<vmem>>, vector<1x8x128xf32>
    %87 = vector.shape_cast %86 : vector<1x8x128xf32> to vector<8x128xf32>
    %88 = vector.shape_cast %85 : vector<8x128xf32> to vector<1x8x128xf32>
    tpu.vector_store %arg9[%c0_106, %c0_107, %c0_108], %88 {strides = array<i32>} : memref<1x8x128xf32, #tpu.memory_space<vmem>>, vector<1x8x128xf32>,
    return
  }
  func.func @transform_0(%arg0: i32) -> (i32, i32, i32) {
    %c0_i32 = arith.constant 0 : i32
    %c0_i32_0 = arith.constant 0 : i32
    %c0_i32_1 = arith.constant 0 : i32
    return %arg0, %c0_i32, %c0_i32_0 : i32, i32, i32
  }
  func.func @transform_1(%arg0: i32) -> (i32, i32, i32) {
    %c0_i32 = arith.constant 0 : i32
    %c0_i32_0 = arith.constant 0 : i32
    %c0_i32_1 = arith.constant 0 : i32
    return %arg0, %c0_i32, %c0_i32_0 : i32, i32, i32
  }
  func.func @transform_2(%arg0: i32) -> (i32, i32) {
    %c0_i32 = arith.constant 0 : i32
    %c0_i32_0 = arith.constant 0 : i32
    %c0_i32_1 = arith.constant 0 : i32
    return %c0_i32, %c0_i32_0 : i32, i32
  }
  func.func @transform_3(%arg0: i32) -> (i32, i32) {
    %c0_i32 = arith.constant 0 : i32
    %c0_i32_0 = arith.constant 0 : i32
    %c0_i32_1 = arith.constant 0 : i32
    return %c0_i32, %c0_i32_0 : i32, i32
  }
  func.func @transform_4(%arg0: i32) -> (i32, i32) {
    %c0_i32 = arith.constant 0 : i32
    %c0_i32_0 = arith.constant 0 : i32
    %c0_i32_1 = arith.constant 0 : i32
    return %c0_i32, %c0_i32_0 : i32, i32
  }
  func.func @transform_5(%arg0: i32) -> (i32, i32) {
    %c0_i32 = arith.constant 0 : i32
    %c0_i32_0 = arith.constant 0 : i32
    %c0_i32_1 = arith.constant 0 : i32
    return %c0_i32, %c0_i32_0 : i32, i32
  }
  func.func @transform_6(%arg0: i32) -> (i32, i32) {
    %c0_i32 = arith.constant 0 : i32
    %c0_i32_0 = arith.constant 0 : i32
    %c0_i32_1 = arith.constant 0 : i32
    return %c0_i32, %c0_i32_0 : i32, i32
  }
  func.func @transform_7(%arg0: i32) -> (i32, i32) {
    %c0_i32 = arith.constant 0 : i32
    %c0_i32_0 = arith.constant 0 : i32
    %c0_i32_1 = arith.constant 0 : i32
    return %c0_i32, %c0_i32_0 : i32, i32
  }
  func.func @transform_8(%arg0: i32) -> (i32, i32, i32) {
    %c0_i32 = arith.constant 0 : i32
    %c0_i32_0 = arith.constant 0 : i32
    %c0_i32_1 = arith.constant 0 : i32
    return %arg0, %c0_i32, %c0_i32_0 : i32, i32, i32
  }
}

</mosaic_0001>

<bundles_post_ra>
// kernel: up_forward.1
= control target key start
LH: loop header
LB: loop body
LE: loop exit
PB: predicated region body
PF: predicated region fallthrough
CT: control target
= control target key end

     0   :  { %s943_s27 = smov 0   ;;  %s1070_s0 = inlined_call_operand.vmem [shape: f32[2,8,128], index: 0, kind: input, shape index: {}]   ;;  %s1071_s1 = inlined_call_operand.vmem [shape: f32[2,8,128], index: 1, kind: input, shape index: {}]   ;;  %s1072_s2 = inlined_call_operand.vmem [shape: f32[8,56], index: 2, kind: input, shape index: {}]   ;;  %s1073_s3 = inlined_call_operand.vmem [shape: f32[8,1], index: 3, kind: input, shape index: {}]   ;;  %s1074_s4 = inlined_call_operand.vmem [shape: f32[8,144], index: 4, kind: input, shape index: {}]   ;;  %s1075_s5 = inlined_call_operand.vmem [shape: f32[8,1], index: 5, kind: input, shape index: {}]   ;;  %s1076_s6 = inlined_call_operand.vmem [shape: f32[8,72], index: 6, kind: input, shape index: {}]   ;;  %s1077_s7 = inlined_call_operand.vmem [shape: f32[8,1], index: 7, kind: input, shape index: {}]   ;;  %s1078_s8 = inlined_call_operand.vmem [shape: f32[2,8,128], index: 8, kind: output, shape index: {}]  }
   0x1 LB: > { %s785_s28 = sadd.s32 4294967295, %s883_s27   ;;  %p789_p0 = scmp.ge.s32.totalorder %s883_s27, 1  ;;  %s883_s27 = sphi %s943_s27, %s18_s27  }
   0x2   : > { %p270_p1 = scmp.lt.s32.totalorder %s883_s27, 3 }
   0x4   : > { %p271_p2 = pnand %p789_p0, %p270_p1 }
   0x5   : > { %p306_p3 = scmp.lt.s32.totalorder (!%p271_p2), %s785_s28, 1  ;;  %s886_s11 = smov (!%p271_p2), 122  }
   0x6   : > { %274 = sbr.rel (%p271_p2) target bundleno = 1363 (0x553), region = 52  ;;  %s887_s12 = smov (!%p271_p2), 124  }
   0x7   : > { %s890_s13 = smov (!%p271_p2), 123   ;;  %s891_s14 = smov (!%p271_p2), 125  }
   0x8   : > { %s892_s15 = smov (!%p271_p2), 126   ;;  %s893_s16 = smov (!%p271_p2), 127  }
   0x9   : > { %s894_s21 = smov (!%p271_p2), 3   ;;  %s895_s25 = smov (!%p271_p2), 121  }
   0xa   : > { %s896_s26 = smov (!%p271_p2), 120   ;;  %s897_s19 = smov (!%p271_p2), 1  }
   0xb   : > { %v885_v0 = vmov 0.0   ;;  %s1080_s28 = smov (!%p306_p3, %s785_s28), 1  ;;  %vm888_vm0 = vmmov 0   ;;  %v889_v2 = vmov 0   ;;  %v339_v3 = vld [vmem:[%s1073_s3] sm:$0xff]  ;;  %vm345_vm1 = vcmask 457728  }
   0xc   : > { %816 = vmatprep.subr.mxu0 %v885_v0  ;;  %494 = vmatprep.subr.mxu1 %v885_v0  ;;  %s953_s29 = sshll.u32 %s1080_s28, 3  ;;  %v338_v10 = vld [vmem:[%s1072_s2] sm:$0xff]  ;;  %vm420_vm2 = vcmask 23552   ;;  %vm422_vm3 = vcmask 212144   ;;  %vm428_vm4 = vcmask 179224   ;;  %v483_v19 = vld [vmem:[%s1074_s4 + $0x8] sm:$0xff] }
   0xd   : > { %s309_s10 = scalar_lea.vmem %s1070_s0, %s953_s29  ;;  %830 = vmatprep.mubr.msk.f32.mxu0 %vm888_vm0, %v885_v0  ;;  %875 = vset.pattern.permute.xlu0 %v889_v2  ;;  %421 = vst.msk [vmem:[#allocation2] sm:$0xff] %vm420_vm2, %v885_v0  ;;  %s313_s24 = scalar_lea.vmem %s1071_s1, %s953_s29  ;;  %vm490_vm5 = vcmask 130048   ;;  %v484_v22 = vld [vmem:[%s1075_s5] sm:$0xff]  ;;  %vm565_vm6 = vcmask 7168   ;;  %vm567_vm7 = vcmask 1047704   ;;  %vm569_vm8 = vcmask 64512  }
   0xe   : > { %v318_v1 = vld [vmem:[%s309_s10] sm:$0xff]  ;;  %876 = vset.pattern.permute.xlu1 %v889_v2  ;;  %423 = vst.msk [vmem:[#allocation2] sm:$0xff] %vm422_vm3, %v885_v0  ;;  %794 = vmatprep.mubr.msk.f32.mxu1 %vm490_vm5, %v483_v19  ;;  %vm575_vm9 = vcmask 154632   ;;  %vm634_vm10 = vcmask 982016   ;;  %vm627_vm11 = vcmask 990208   ;;  %vm620_vm12 = vcmask 998400  }
   0xf   : > { %335 = vrot.lane.b32.xlu0 %v318_v1, %s886_s11  ;;  %329 = vrot.lane.b32.xlu1 %v318_v1, %s887_s12  ;;  %v430_v18 = vld [vmem:[%s313_s24] sm:$0xff]  ;;  %566 = vst.msk [vmem:[#allocation3] sm:$0xff] %vm565_vm6, %v885_v0  ;;  %vm613_vm13 = vcmask 1006592   ;;  %vm606_vm14 = vcmask 1014784   ;;  %vm599_vm15 = vcmask 1022976   ;;  %vm644_vm2 = vcmask 588800  }
  0x10   : > { %v482_v36 = vld [vmem:[%s1074_s4] sm:$0xff]  ;;  %568 = vst.msk [vmem:[#allocation3] sm:$0xff] %vm567_vm7, %v885_v0 }
  0x11   : > { %570 = vst.msk [vmem:[#allocation3 + $0x8] sm:$0xff] %vm569_vm8, %v885_v0  ;;  %v638_v46 = vld [vmem:[%s1077_s7] sm:$0xff] }
  0x13   : > { %332 = vrot.lane.b32.xlu0 %v318_v1, %s890_s13  ;;  %326 = vrot.lane.b32.xlu1 %v318_v1, %s891_s14 }
  0x17   : > { %323 = vrot.lane.b32.xlu0 %v318_v1, %s892_s15  ;;  %320 = vrot.lane.b32.xlu1 %v318_v1, %s893_s16 }
  0x18   : > { %v578_v43 = vld [vmem:[#allocation3 + $0x8] sm:$0xff] }
  0x1b   : > { %342 = vperm.xlu0 %875, %v339_v3  }
  0x81   : > { %v336_v4 = vpop.permute.xlu0 %335  ;;  %v330_v5 = vpop.permute.xlu1 %329 }
  0x82   : > { %817 = vmatpush3.msra.mxu0 %v336_v4 }
  0x83   : > { %818 = vmatprep.subr.mxu0 %v885_v0 }
  0x85   : > { %v333_v6 = vpop.permute.xlu0 %332  ;;  %v327_v7 = vpop.permute.xlu1 %326 }
  0x86   : > { %819 = vmatpush3.msra.mxu0 %v333_v6 }
  0x87   : > { %820 = vmatprep.subr.mxu0 %v885_v0 }
  0x88   : > { %821 = vmatpush3.msra.mxu0 %v330_v5 }
  0x89   : > { %822 = vmatprep.subr.mxu0 %v885_v0  ;;  %v324_v8 = vpop.permute.xlu0 %323  ;;  %v321_v9 = vpop.permute.xlu1 %320 }
  0x8a   : > { %823 = vmatpush3.msra.mxu0 %v327_v7 }
  0x8b   : > { %824 = vmatprep.subr.mxu0 %v885_v0 }
  0x8c   : > { %825 = vmatpush3.msra.mxu0 %v324_v8  ;;  %v637_v8 = vld [vmem:[%s1076_s6] sm:$0xff] }
  0x8d   : > { %826 = vmatprep.subr.mxu0 %v885_v0 }
  0x8e   : > { %827 = vmatpush3.msra.mxu0 %v321_v9 }
  0x8f   : > { %828 = vmatprep.subr.mxu0 %v885_v0 }
  0x90   : > { %829 = vmatpush3.msra.mxu0 %v318_v1 }
  0x91   : > { %831 = vmatmul.mubr.msk.f32.vlgmr.msra.gmra.mxu0 %vm345_vm1, %v338_v10  ;;  %833 = vmatprep.subr.mxu0 %v885_v0  ;;  %vm585_vm1 = vcmask 1039360  }
  0x92   : > { %851 = vmatprep.mubr.msk.f32.mxu0 %vm888_vm0, %v885_v0  ;;  %vm592_vm0 = vcmask 1031168  }
  0x96   : > { %v343_v11 = vpop.permute.xlu0 %342 }
 0x151   : > { %v415_v12 = vpop.f32.mrf.mxu0 }
 0x152   : > { %v416_v13 = vadd.f32 %v415_v12, %v343_v11 }
 0x153   : > { %v832_v14 = vpop.f32.mrf.mxu0 }
 0x154   : > { %v419_v15 = vmax.f32 %v416_v13, 0.0 }
 0x156   : > { %425 = vrot.lane.b32.xlu1 %v419_v15, %s894_s21 }
 0x1c8   : > { %v426_v16 = vpop.permute.xlu1 %425 }
 0x1c9   : > { %429 = vst.msk [vmem:[#allocation2] sm:$0xff] %vm428_vm4, %v426_v16 }
 0x1d0   : > { %v431_v17 = vld [vmem:[#allocation2] sm:$0xff] }
 0x1d1   : > { %473 = vrot.lane.b32.xlu0 %v431_v17, %s886_s11  ;;  %458 = vrot.lane.b32.xlu1 %v431_v17, %s893_s16 }
 0x1d5   : > { %467 = vrot.lane.b32.xlu0 %v431_v17, %s887_s12  ;;  %470 = vrot.lane.b32.xlu1 %v431_v17, %s890_s13 }
 0x1d9   : > { %461 = vrot.lane.b32.xlu0 %v431_v17, %s892_s15  ;;  %464 = vrot.lane.b32.xlu1 %v431_v17, %s891_s14 }
 0x1dd   : > { %451 = vrot.lane.b32.xlu0 %v430_v18, %s895_s25  ;;  %454 = vrot.lane.b32.xlu1 %v430_v18, %s896_s26 }
 0x1e1   : > { %445 = vrot.lane.b32.xlu0 %v430_v18, %s890_s13  ;;  %448 = vrot.lane.b32.xlu1 %v430_v18, %s886_s11 }
 0x1e5   : > { %439 = vrot.lane.b32.xlu0 %v430_v18, %s891_s14  ;;  %442 = vrot.lane.b32.xlu1 %v430_v18, %s887_s12 }
 0x1e9   : > { %433 = vrot.lane.b32.xlu0 %v430_v18, %s893_s16  ;;  %436 = vrot.lane.b32.xlu1 %v430_v18, %s892_s15 }
 0x1ed   : > { %476 = vrot.lane.b32.xlu0 %v431_v17, %s895_s25 }
 0x243   : > { %v474_v20 = vpop.permute.xlu0 %473  ;;  %v459_v21 = vpop.permute.xlu1 %458 }
 0x244   : > { %495 = vmatpush1.msra.mxu1 %v474_v20  ;;  %478 = vrot.lane.b32.xlu1 %v459_v21, %s895_s25 }
 0x245   : > { %496 = vmatprep.subr.mxu1 %v885_v0 }
 0x247   : > { %v468_v23 = vpop.permute.xlu0 %467  ;;  %v471_v24 = vpop.permute.xlu1 %470 }
 0x248   : > { %497 = vmatpush1.msra.mxu1 %v471_v24  ;;  %487 = vperm.xlu1 %876, %v484_v22  }
 0x249   : > { %498 = vmatprep.subr.mxu1 %v885_v0 }
 0x24a   : > { %499 = vmatpush1.msra.mxu1 %v468_v23 }
 0x24b   : > { %v462_v25 = vpop.permute.xlu0 %461  ;;  %500 = vmatprep.subr.mxu1 %v885_v0  ;;  %v465_v26 = vpop.permute.xlu1 %464 }
 0x24c   : > { %501 = vmatpush1.msra.mxu1 %v465_v26 }
 0x24d   : > { %502 = vmatprep.subr.mxu1 %v885_v0 }
 0x24e   : > { %503 = vmatpush1.msra.mxu1 %v462_v25 }
 0x24f   : > { %v452_v27 = vpop.permute.xlu0 %451  ;;  %504 = vmatprep.subr.mxu1 %v885_v0  ;;  %v455_v28 = vpop.permute.xlu1 %454 }
 0x250   : > { %505 = vmatpush1.msra.mxu1 %v459_v21 }
 0x251   : > { %506 = vmatprep.subr.mxu1 %v885_v0 }
 0x252   : > { %507 = vmatpush1.msra.mxu1 %v431_v17 }
 0x253   : > { %508 = vmatprep.subr.mxu1 %v885_v0  ;;  %v449_v29 = vpop.permute.xlu1 %448  ;;  %v446_v30 = vpop.permute.xlu0 %445 }
 0x254   : > { %509 = vmatpush1.msra.mxu1 %v455_v28 }
 0x255   : > { %510 = vmatprep.subr.mxu1 %v885_v0 }
 0x256   : > { %511 = vmatpush1.msra.mxu1 %v452_v27 }
 0x257   : > { %512 = vmatprep.subr.mxu1 %v885_v0  ;;  %v443_v31 = vpop.permute.xlu1 %442  ;;  %v440_v32 = vpop.permute.xlu0 %439 }
 0x258   : > { %513 = vmatpush1.msra.mxu1 %v449_v29 }
 0x259   : > { %514 = vmatprep.subr.mxu1 %v885_v0 }
 0x25a   : > { %515 = vmatpush1.msra.mxu1 %v446_v30 }
 0x25b   : > { %516 = vmatprep.subr.mxu1 %v885_v0  ;;  %v437_v33 = vpop.permute.xlu1 %436  ;;  %v434_v34 = vpop.permute.xlu0 %433 }
 0x25c   : > { %517 = vmatpush1.msra.mxu1 %v443_v31 }
 0x25d   : > { %518 = vmatprep.subr.mxu1 %v885_v0 }
 0x25e   : > { %519 = vmatpush1.msra.mxu1 %v440_v32 }
 0x25f   : > { %520 = vmatprep.subr.mxu1 %v885_v0  ;;  %v477_v37 = vpop.permute.xlu0 %476 }
 0x260   : > { %521 = vmatpush1.msra.mxu1 %v437_v33 }
 0x261   : > { %522 = vmatprep.subr.mxu1 %v885_v0 }
 0x262   : > { %523 = vmatpush1.msra.mxu1 %v434_v34 }
 0x263   : > { %524 = vmatprep.subr.mxu1 %v885_v0 }
 0x264   : > { %525 = vmatpush1.msra.mxu1 %v430_v18 }
 0x265   : > { %554 = vmatprep.subr.mxu1 %v885_v0 }
 0x2b6   : > { %v479_v35 = vpop.permute.xlu1 %478 }
 0x2b7   : > { %555 = vmatpush2.msra.mxu1 %v479_v35 }
 0x2b8   : > { %556 = vmatprep.subr.mxu1 %v885_v0 }
 0x2b9   : > { %557 = vmatpush2.msra.mxu1 %v477_v37 }
 0x2ba   : > { %559 = vmatmul.mubr.f32.vlgmr.msra.gmra.mxu1 %v482_v36 }
 0x2c3   : > { %v488_v38 = vpop.permute.xlu1 %487 }
 0x37a   : > { %v560_v39 = vpop.f32.mrf.mxu1 }
 0x37b   : > { %v561_v40 = vadd.f32 %v560_v39, %v488_v38 }
 0x37c   : > { %v562_v41 = vpop.f32.mrf.mxu1 }
 0x37d   : > { %v564_v42 = vmax.f32 %v561_v40, 0.0 }
 0x37f   : > { %572 = vrot.lane.b32.xlu0 %v564_v42, %s897_s19 }
 0x383   : > { %632 = vrot.lane.b32.xlu0 %v578_v43, %s896_s26 }
 0x387   : > { %625 = vrot.lane.b32.xlu0 %v578_v43, %s895_s25 }
 0x38b   : > { %618 = vrot.lane.b32.xlu0 %v578_v43, %s886_s11 }
 0x38f   : > { %611 = vrot.lane.b32.xlu0 %v578_v43, %s890_s13 }
 0x393   : > { %604 = vrot.lane.b32.xlu0 %v578_v43, %s887_s12 }
 0x397   : > { %597 = vrot.lane.b32.xlu0 %v578_v43, %s891_s14 }
 0x39b   : > { %590 = vrot.lane.b32.xlu0 %v578_v43, %s892_s15 }
 0x39f   : > { %583 = vrot.lane.b32.xlu0 %v578_v43, %s893_s16 }
 0x3f1   : > { %v573_v44 = vpop.permute.xlu0 %572 }
 0x3f2   : > { %576 = vst.msk [vmem:[#allocation3] sm:$0xff] %vm575_vm9, %v573_v44 }
 0x3f5   : > { %v633_v47 = vpop.permute.xlu0 %632 }
 0x3f9   : > { %v577_v45 = vld [vmem:[#allocation3] sm:$0xff]  ;;  %v626_v48 = vpop.permute.xlu0 %625 }
 0x3fa   : > { %630 = vrot.lane.b32.xlu1 %v577_v45, %s896_s26 }
 0x3fd   : > { %v619_v49 = vpop.permute.xlu0 %618 }
 0x3fe   : > { %623 = vrot.lane.b32.xlu1 %v577_v45, %s895_s25 }
 0x401   : > { %v612_v52 = vpop.permute.xlu0 %611 }
 0x402   : > { %616 = vrot.lane.b32.xlu1 %v577_v45, %s886_s11 }
 0x405   : > { %v605_v56 = vpop.permute.xlu0 %604 }
 0x406   : > { %609 = vrot.lane.b32.xlu1 %v577_v45, %s890_s13 }
 0x409   : > { %v598_v60 = vpop.permute.xlu0 %597 }
 0x40a   : > { %602 = vrot.lane.b32.xlu1 %v577_v45, %s887_s12 }
 0x40d   : > { %v591_v1 = vpop.permute.xlu0 %590 }
 0x40e   : > { %595 = vrot.lane.b32.xlu1 %v577_v45, %s891_s14 }
 0x411   : > { %v584_v5 = vpop.permute.xlu0 %583 }
 0x412   : > { %588 = vrot.lane.b32.xlu1 %v577_v45, %s892_s15  ;;  %s317_s15 = scalar_lea.vmem %s1078_s8, %s953_s29 }
 0x416   : > { %581 = vrot.lane.b32.xlu1 %v577_v45, %s893_s16 }
 0x41a   : > { %641 = vperm.xlu1 %876, %v638_v46  }
 0x46c   : > { %v631_v50 = vpop.permute.xlu1 %630 }
 0x46d   : > { %v635_v51 = vsel %vm634_vm10, %v631_v50, %v633_v47 }
 0x46e   : > { %834 = vmatpush3.msra.mxu0 %v635_v51 }
 0x46f   : > { %835 = vmatprep.subr.mxu0 %v885_v0 }
 0x470   : > { %v624_v53 = vpop.permute.xlu1 %623 }
 0x471   : > { %v628_v54 = vsel %vm627_vm11, %v624_v53, %v626_v48 }
 0x472   : > { %836 = vmatpush3.msra.mxu0 %v628_v54 }
 0x473   : > { %837 = vmatprep.subr.mxu0 %v885_v0 }
 0x474   : > { %v617_v55 = vpop.permute.xlu1 %616 }
 0x475   : > { %v621_v57 = vsel %vm620_vm12, %v617_v55, %v619_v49 }
 0x476   : > { %838 = vmatpush3.msra.mxu0 %v621_v57 }
 0x477   : > { %839 = vmatprep.subr.mxu0 %v885_v0 }
 0x478   : > { %v610_v58 = vpop.permute.xlu1 %609 }
 0x479   : > { %v614_v59 = vsel %vm613_vm13, %v610_v58, %v612_v52 }
 0x47a   : > { %840 = vmatpush3.msra.mxu0 %v614_v59 }
 0x47b   : > { %841 = vmatprep.subr.mxu0 %v885_v0 }
 0x47c   : > { %v603_v61 = vpop.permute.xlu1 %602 }
 0x47d   : > { %v607_v62 = vsel %vm606_vm14, %v603_v61, %v605_v56 }
 0x47e   : > { %842 = vmatpush3.msra.mxu0 %v607_v62 }
 0x47f   : > { %843 = vmatprep.subr.mxu0 %v885_v0 }
 0x480   : > { %v596_v63 = vpop.permute.xlu1 %595 }
 0x481   : > { %v600_v2 = vsel %vm599_vm15, %v596_v63, %v598_v60 }
 0x482   : > { %844 = vmatpush3.msra.mxu0 %v600_v2 }
 0x483   : > { %845 = vmatprep.subr.mxu0 %v885_v0 }
 0x484   : > { %v589_v3 = vpop.permute.xlu1 %588 }
 0x485   : > { %v593_v4 = vsel %vm592_vm0, %v589_v3, %v591_v1 }
 0x486   : > { %846 = vmatpush3.msra.mxu0 %v593_v4 }
 0x487   : > { %847 = vmatprep.subr.mxu0 %v885_v0 }
 0x488   : > { %v582_v6 = vpop.permute.xlu1 %581 }
 0x489   : > { %v586_v7 = vsel %vm585_vm1, %v582_v6, %v584_v5 }
 0x48a   : > { %848 = vmatpush3.msra.mxu0 %v586_v7 }
 0x48b   : > { %849 = vmatprep.subr.mxu0 %v885_v0 }
 0x48c   : > { %850 = vmatpush3.msra.mxu0 %v577_v45 }
 0x48d   : > { %852 = vmatmul.mubr.msk.f32.vlgmr.msra.gmra.mxu0 %vm644_vm2, %v637_v8 }
 0x495   : > { %v642_v9 = vpop.permute.xlu1 %641 }
 0x54d   : > { %v714_v10 = vpop.f32.mrf.mxu0 }
 0x54e   : > { %v715_v11 = vadd.f32 %v714_v10, %v642_v9 }
 0x54f   : > { %v853_v12 = vpop.f32.mrf.mxu0 }
 0x550   : > { %v718_v13 = vmax.f32 %v715_v11, 0.0 }
 0x552   : > { %719 = vst [vmem:[%s317_s15] sm:$0xff] %v718_v13 }
 0x553 PF: > { %s18_s27 = sadd.s32 1, %s883_s27  }
 0x554   : > { %p15_p4 = scmp.ge.s32.totalorder %s18_s27, 4  }
 0x556   :  { %17 = sbr.rel (!%p15_p4) target bundleno = 1 (0x1), region = 85 }

</bundles_post_ra>
